<compile_context>
chip_gen: v7x
topology: tpu7x:2x2x1
jax: 0.10.0
libtpu: 0.0.40
codegen_flags: <defaults>
</compile_context>

<pallas_src>
import jax
import jax.numpy as jnp
from jax.experimental import pallas as pl
from jax.experimental.pallas import tpu as pltpu

MODEL_DIM = 32
NUM_HEADS = 4
DIM_PER_HEAD = MODEL_DIM // NUM_HEADS
LANES = 128
FOLD = LANES // MODEL_DIM          # 4 logical rows folded into the lane axis
# PyTorch: scale = (key.size(-1) // num_heads) ** -0.5 (after the head view).
# Irrelevant to the output (softmax over a length-1 axis); reference only.
SCALE = float((DIM_PER_HEAD // NUM_HEADS) ** (-0.5))
LN_EPS = 1e-5


def mha_kernel(value_ref, w_ref, pack_ref, out_ref):
    x_in = value_ref[...]              # (TBf, 128): 4 logical rows per folded row
    wv = w_ref[0]                      # (128, 128) block-diag value projection
    wf = w_ref[1]                      # (128, 128) block-diag final projection
    a_seg = w_ref[2]                   # (128, 128) block-diag ones(32,32)/32
    bv = pack_ref[0:1, :]              # (1, 128) lane-tiled biases / LN affine
    bf = pack_ref[1:2, :]
    gamma = pack_ref[2:3, :]
    beta = pack_ref[3:4, :]

    # Value projection + ReLU.  Attention over a per-head seq length of 1 is
    # identically 1.0, so context == vp (key/query/logits/softmax path is dead).
    vp = jnp.maximum(
        jnp.dot(x_in, wv, preferred_element_type=jnp.float32) + bv, 0.0)

    # Final linear + residual.
    # TODO(synk): dropout layers have p=0.0 (identity); no RNG emitted.
    x = x_in + jnp.dot(vp, wf, preferred_element_type=jnp.float32) + bf

    # Segmented (per logical 32-wide row) LayerNorm, one pass, MXU reductions.
    mean = jnp.dot(x, a_seg, preferred_element_type=jnp.float32)
    ex2 = jnp.dot(x * x, a_seg, preferred_element_type=jnp.float32)
    var = ex2 - mean * mean
    scale = gamma * jax.lax.rsqrt(var + LN_EPS)      # rsqrt -> EUP (free slot)
    out_ref[...] = x * scale + (beta - mean * scale)


def _round_up(n, m):
    return (n + m - 1) // m * m


def multi_head_attention(key, value, query, params, *, tile_b=8192):
    """Output equals LayerNorm(value + linear_final(relu(linear_v(value)))).
    key/query only feed the attention logits, which are dead because the
    per-head sequence length is 1 (softmax over a length-1 axis is 1.0).
    Only valid for 2-D (batch, model_dim) inputs, matching the PyTorch use."""
    del key, query  # mathematically dead for per-head sequence length 1
    B, D = value.shape
    assert D == MODEL_DIM, "kernel assumes 2-D (batch, model_dim) inputs"

    # Folded batch tiling: sublane-aligned, capped at ~tile_b logical rows, and
    # >=2 grid tiles whenever possible so v7x megacore uses both TensorCores.
    Bf = pl.cdiv(B, FOLD)                                    # folded rows needed
    TBf = max(8, min(tile_b // FOLD, _round_up(pl.cdiv(Bf, 2), 8)))
    Bf_p = _round_up(Bf, TBf)
    Bp = Bf_p * FOLD

    value_p = value if Bp == B else jnp.pad(value, ((0, Bp - B), (0, 0)))
    value_f = value_p.reshape(Bf_p, LANES)                   # free contiguous reshape

    # 128x128 block-diagonal operands: lane segments never mix, so each logical
    # 32-wide row is processed independently even though 4 share a vreg row.
    eye4 = jnp.eye(FOLD, dtype=jnp.float32)
    wv_b = jnp.kron(eye4, params["wv"].astype(jnp.float32))
    wf_b = jnp.kron(eye4, params["wf"].astype(jnp.float32))
    a_seg = jnp.kron(eye4, jnp.full((D, D), 1.0 / D, jnp.float32))
    w_stack = jnp.stack([wv_b, wf_b, a_seg], axis=0)         # (3, 128, 128)

    # Lane-tiled biases / LN affine packed into one (8, 128) slab (one DMA).
    pack = jnp.concatenate(
        [jnp.tile(params["bv"], (1, FOLD)),
         jnp.tile(params["bf"], (1, FOLD)),
         jnp.tile(params["gamma"], (1, FOLD)),
         jnp.tile(params["beta"], (1, FOLD)),
         jnp.zeros((4, LANES), jnp.float32)], axis=0)        # (8, 128)

    out_f = pl.pallas_call(
        mha_kernel,
        out_shape=jax.ShapeDtypeStruct((Bf_p, LANES), jnp.float32),
        grid_spec=pltpu.PrefetchScalarGridSpec(
            num_scalar_prefetch=0,
            grid=(Bf_p // TBf,),
            in_specs=[
                pl.BlockSpec((TBf, LANES), lambda i: (i, 0)),          # batch stream
                pl.BlockSpec((3, LANES, LANES), lambda i: (0, 0, 0)),  # weights resident
                pl.BlockSpec((8, LANES), lambda i: (0, 0)),            # bias/LN resident
            ],
            out_specs=pl.BlockSpec((TBf, LANES), lambda i: (i, 0)),
        ),
        compiler_params=pltpu.CompilerParams(
            dimension_semantics=("parallel",),     # v7x: batch tiles split across TCs
            vmem_limit_bytes=32 * 1024 * 1024,     # headroom for large folded tiles
        ),
    )(value_f, w_stack, pack)

    out = out_f.reshape(Bp, D)[:B]

    # Softmax over the per-head seq axis (length 1) is identically 1.0; return
    # the constant directly, shaped like PyTorch's attention: (B*H, 1, 1).
    attention = jnp.ones((B * NUM_HEADS, 1, 1), jnp.float32)
    return out, attention


def reference(key, value, query, params):
    """Pure-JAX transcription of the full PyTorch forward (incl. dead path)."""
    relu = lambda x: jnp.maximum(x, 0.0)
    kp = relu(key @ params["wk"] + params["bk"])
    vp = relu(value @ params["wv"] + params["bv"])
    qp = relu(query @ params["wq"] + params["bq"])
    B = key.shape[0]
    k3 = kp.reshape(B * NUM_HEADS, 1, DIM_PER_HEAD)
    v3 = vp.reshape(B * NUM_HEADS, 1, DIM_PER_HEAD)
    q3 = qp.reshape(B * NUM_HEADS, 1, DIM_PER_HEAD)
    logits = jnp.einsum("bqd,bkd->bqk", q3, k3) * SCALE
    attn = jax.nn.softmax(logits, axis=2)
    ctx = jnp.einsum("bqk,bkd->bqd", attn, v3).reshape(B, MODEL_DIM)
    out = ctx @ params["wf"] + params["bf"]
    x = value + out
    mean = jnp.mean(x, axis=-1, keepdims=True)
    var = jnp.mean((x - mean) ** 2, axis=-1, keepdims=True)
    out_ln = (x - mean) / jnp.sqrt(var + LN_EPS) * params["gamma"] + params["beta"]
    return out_ln, attn


if __name__ == "__main__":
    rng = jax.random.PRNGKey(0)
    ks = jax.random.split(rng, 8)

    def lin_init(k, fan_in, fan_out):
        bound = 1.0 / (fan_in ** 0.5)
        kw, kb = jax.random.split(k)
        w = jax.random.uniform(kw, (fan_in, fan_out), jnp.float32, -bound, bound)
        b = jax.random.uniform(kb, (1, fan_out), jnp.float32, -bound, bound)
        return w, b

    wk, bk = lin_init(ks[3], MODEL_DIM, MODEL_DIM)
    wv, bv = lin_init(ks[4], MODEL_DIM, MODEL_DIM)
    wq, bq = lin_init(ks[5], MODEL_DIM, MODEL_DIM)
    wf, bf = lin_init(ks[6], MODEL_DIM, MODEL_DIM)
    gamma = jnp.ones((1, MODEL_DIM), jnp.float32)
    beta = jnp.zeros((1, MODEL_DIM), jnp.float32)
    params = dict(wk=wk, bk=bk, wv=wv, bv=bv, wq=wq, bq=bq, wf=wf, bf=bf,
                  gamma=gamma, beta=beta)

    # B=2 is the spec's shape; B=37 additionally exercises the lane-fold
    # padding (non-multiple of 4) and a 2-tile grid.
    for B in (2, 37):
        key = jax.random.normal(jax.random.fold_in(ks[0], B), (B, MODEL_DIM), jnp.float32)
        value = jax.random.normal(jax.random.fold_in(ks[1], B), (B, MODEL_DIM), jnp.float32)
        query = jax.random.normal(jax.random.fold_in(ks[2], B), (B, MODEL_DIM), jnp.float32)

        out, attention = multi_head_attention(key, value, query, params)
        jax.block_until_ready((out, attention))

        ref_out, ref_attn = reference(key, value, query, params)
        assert out.shape == (B, MODEL_DIM)
        assert attention.shape == (B * NUM_HEADS, 1, 1)
        assert jnp.allclose(out, ref_out, atol=1e-4, rtol=1e-4), \
            float(jnp.max(jnp.abs(out - ref_out)))
        assert jnp.allclose(attention.reshape(-1), ref_attn.reshape(-1), atol=1e-6)

    print("KERNEL_OK")
</pallas_src>

<mosaic_0001>
module attributes {stable_mosaic.version = 11 : i64} {
  func.func @mha_kernel(%arg0: i32, %arg1: memref<8x128xf32, #tpu.memory_space<vmem>>, %arg2: memref<3x128x128xf32, #tpu.memory_space<vmem>>, %arg3: memref<8x128xf32, #tpu.memory_space<vmem>>, %arg4: memref<8x128xf32, #tpu.memory_space<vmem>>) attributes {dimension_semantics = [#tpu.dimension_semantics<parallel>], iteration_bounds = array<i64: 1>, scalar_prefetch = 0 : i64, scratch_operands = 0 : i64, tpu.core_type = #tpu.core_type<tc>, window_params = [{transform_indices = @transform_0, window_bounds = array<i64: 8, 128>}, {pipeline_mode = #tpu.pipeline_mode<synchronous>, transform_indices = @transform_1, window_bounds = array<i64: 3, 128, 128>}, {pipeline_mode = #tpu.pipeline_mode<synchronous>, transform_indices = @transform_2, window_bounds = array<i64: 8, 128>}, {transform_indices = @transform_3, window_bounds = array<i64: 8, 128>}]} {
    %c0 = arith.constant 0 : index
    %c0_0 = arith.constant 0 : index
    %0 = vector.load %arg1[%c0, %c0_0] : memref<8x128xf32, #tpu.memory_space<vmem>>, vector<8x128xf32>
    %c0_1 = arith.constant 0 : index
    %c0_2 = arith.constant 0 : index
    %c0_3 = arith.constant 0 : index
    %1 = vector.load %arg2[%c0_1, %c0_2, %c0_3] : memref<3x128x128xf32, #tpu.memory_space<vmem>>, vector<1x128x128xf32>
    %2 = vector.shape_cast %1 : vector<1x128x128xf32> to vector<128x128xf32>
    %c1 = arith.constant 1 : index
    %c0_4 = arith.constant 0 : index
    %c0_5 = arith.constant 0 : index
    %3 = vector.load %arg2[%c1, %c0_4, %c0_5] : memref<3x128x128xf32, #tpu.memory_space<vmem>>, vector<1x128x128xf32>
    %4 = vector.shape_cast %3 : vector<1x128x128xf32> to vector<128x128xf32>
    %c2 = arith.constant 2 : index
    %c0_6 = arith.constant 0 : index
    %c0_7 = arith.constant 0 : index
    %5 = vector.load %arg2[%c2, %c0_6, %c0_7] : memref<3x128x128xf32, #tpu.memory_space<vmem>>, vector<1x128x128xf32>
    %6 = vector.shape_cast %5 : vector<1x128x128xf32> to vector<128x128xf32>
    %c0_8 = arith.constant 0 : index
    %c0_9 = arith.constant 0 : index
    %7 = vector.load %arg3[%c0_8, %c0_9] : memref<8x128xf32, #tpu.memory_space<vmem>>, vector<1x128xf32>
    %c1_10 = arith.constant 1 : index
    %c0_11 = arith.constant 0 : index
    %8 = vector.load %arg3[%c1_10, %c0_11] : memref<8x128xf32, #tpu.memory_space<vmem>>, vector<1x128xf32>
    %c2_12 = arith.constant 2 : index
    %c0_13 = arith.constant 0 : index
    %9 = vector.load %arg3[%c2_12, %c0_13] : memref<8x128xf32, #tpu.memory_space<vmem>>, vector<1x128xf32>
    %c3 = arith.constant 3 : index
    %c0_14 = arith.constant 0 : index
    %10 = vector.load %arg3[%c3, %c0_14] : memref<8x128xf32, #tpu.memory_space<vmem>>, vector<1x128xf32>
    %cst = arith.constant dense<0.000000e+00> : vector<8x128xf32>
    %11 = tpu.matmul %0, %2, %cst {dimension_numbers = #tpu.dot_dimension_numbers<[1], [0], [0], [1], [0, 0, 1, 1], [], []>} : vector<8x128xf32>, vector<128x128xf32>, vector<8x128xf32> -> vector<8x128xf32>
    %12 = vector.broadcast %7 : vector<1x128xf32> to vector<8x128xf32>
    %13 = arith.addf %11, %12 : vector<8x128xf32>
    %cst_15 = arith.constant 0.000000e+00 : f32
    %14 = vector.broadcast %cst_15 : f32 to vector<8x128xf32>
    %15 = arith.maximumf %13, %14 : vector<8x128xf32>
    %cst_16 = arith.constant dense<0.000000e+00> : vector<8x128xf32>
    %16 = tpu.matmul %15, %4, %cst_16 {dimension_numbers = #tpu.dot_dimension_numbers<[1], [0], [0], [1], [0, 0, 1, 1], [], []>} : vector<8x128xf32>, vector<128x128xf32>, vector<8x128xf32> -> vector<8x128xf32>
    %17 = arith.addf %0, %16 : vector<8x128xf32>
    %18 = vector.broadcast %8 : vector<1x128xf32> to vector<8x128xf32>
    %19 = arith.addf %17, %18 : vector<8x128xf32>
    %cst_17 = arith.constant dense<0.000000e+00> : vector<8x128xf32>
    %20 = tpu.matmul %19, %6, %cst_17 {dimension_numbers = #tpu.dot_dimension_numbers<[1], [0], [0], [1], [0, 0, 1, 1], [], []>} : vector<8x128xf32>, vector<128x128xf32>, vector<8x128xf32> -> vector<8x128xf32>
    %21 = arith.mulf %19, %19 : vector<8x128xf32>
    %cst_18 = arith.constant dense<0.000000e+00> : vector<8x128xf32>
    %22 = tpu.matmul %21, %6, %cst_18 {dimension_numbers = #tpu.dot_dimension_numbers<[1], [0], [0], [1], [0, 0, 1, 1], [], []>} : vector<8x128xf32>, vector<128x128xf32>, vector<8x128xf32> -> vector<8x128xf32>
    %23 = arith.mulf %20, %20 : vector<8x128xf32>
    %24 = arith.subf %22, %23 : vector<8x128xf32>
    %cst_19 = arith.constant 9.99999974E-6 : f32
    %25 = vector.broadcast %cst_19 : f32 to vector<8x128xf32>
    %26 = arith.addf %24, %25 : vector<8x128xf32>
    %27 = math.rsqrt %26 : vector<8x128xf32>
    %28 = vector.broadcast %9 : vector<1x128xf32> to vector<8x128xf32>
    %29 = arith.mulf %28, %27 : vector<8x128xf32>
    %30 = arith.mulf %19, %29 : vector<8x128xf32>
    %31 = arith.mulf %20, %29 : vector<8x128xf32>
    %32 = vector.broadcast %10 : vector<1x128xf32> to vector<8x128xf32>
    %33 = arith.subf %32, %31 : vector<8x128xf32>
    %34 = arith.addf %30, %33 : vector<8x128xf32>
    %c0_20 = arith.constant 0 : index
    %c0_21 = arith.constant 0 : index
    %35 = vector.load %arg4[%c0_20, %c0_21] : memref<8x128xf32, #tpu.memory_space<vmem>>, vector<8x128xf32>
    tpu.vector_store %arg4[%c0_20, %c0_21], %34 {strides = array<i32>} : memref<8x128xf32, #tpu.memory_space<vmem>>, vector<8x128xf32>,
    return
  }
  func.func @transform_0(%arg0: i32) -> (i32, i32) {
    %c0_i32 = arith.constant 0 : i32
    %c0_i32_0 = arith.constant 0 : i32
    return %arg0, %c0_i32 : i32, i32
  }
  func.func @transform_1(%arg0: i32) -> (i32, i32, i32) {
    %c0_i32 = arith.constant 0 : i32
    %c0_i32_0 = arith.constant 0 : i32
    %c0_i32_1 = arith.constant 0 : i32
    %c0_i32_2 = arith.constant 0 : i32
    return %c0_i32, %c0_i32_0, %c0_i32_1 : i32, i32, i32
  }
  func.func @transform_2(%arg0: i32) -> (i32, i32) {
    %c0_i32 = arith.constant 0 : i32
    %c0_i32_0 = arith.constant 0 : i32
    %c0_i32_1 = arith.constant 0 : i32
    return %c0_i32, %c0_i32_0 : i32, i32
  }
  func.func @transform_3(%arg0: i32) -> (i32, i32) {
    %c0_i32 = arith.constant 0 : i32
    %c0_i32_0 = arith.constant 0 : i32
    return %arg0, %c0_i32 : i32, i32
  }
}

</mosaic_0001>

<bundles_post_ra>
// kernel: tpu_custom_call.1
= control target key start
LH: loop header
LB: loop body
LE: loop exit
PB: predicated region body
PF: predicated region fallthrough
CT: control target
= control target key end

     0   :  { %8 = vsyncpa [#allocation3], 0  ;;  %s967_s0 = inlined_call_operand.hbm [shape: f32[8,128], index: 0, kind: input, shape index: {}]   ;;  %s968_s1 = inlined_call_operand.hbm [shape: f32[3,128,128], index: 1, kind: input, shape index: {}]   ;;  %s969_s2 = inlined_call_operand.hbm [shape: f32[8,128], index: 2, kind: input, shape index: {}]   ;;  %s970_s3 = inlined_call_operand.hbm [shape: f32[8,128], index: 3, kind: output, shape index: {}]  }
   0x1   :  { %9 = vsyncpa [#allocation6], 0 }
   0x2   :  { %10 = vsyncpa [#allocation4], 0  ;;  %s846_s12 = smov [#allocation5]   ;;  %s752_s16 = scalar_lea.hbm %s968_s1, 6144 }
   0x3   :  { %s26_s13 = sshll.u32 %s846_s12, 4  ;;  %p753_p0 = scmp.ne.s32.totalorder %s968_s1, %s752_s16  ;;  %s27_s13 = int_to_ptr.vmem [resolvable:$true] %s26_s13 }
   0x4   :  { %p756_p1 = scmp.lt.u32.totalorder %s752_s16, %s968_s1 }
   0x6   :  { %p758_p2 = pnand %p756_p1, %p753_p0 }
   0x8   :  { %761 = shalt.err (!%p758_p2)
}
   0x9   :  { %s762_s21 = scalar_lea.vmem %s27_s13, 6144  ;;  %p767_p4 = scmp.lt.s32.totalorder %s27_s13, %s27_s13 }
   0xa   :  { %p763_p3 = scmp.ne.s32.totalorder %s27_s13, %s762_s21  ;;  %p768_p5 = scmp.lt.s32.totalorder %s762_s21, %s762_s21 }
   0xc   :  { %p769_p6 = por %p768_p5, %p767_p4 }
   0xe   :  { %p770_p7 = pnand %p769_p6, %p763_p3 }
  0x10   :  { %773 = shalt.err (!%p770_p7)
}
  0x11   :  { %s847_s22 = smov 128   ;;  %s848_s23 = smov 8  }
  0x12   :  { %32 = dma.hbm_to_vmem [thread:$0]  %s968_s1, 6144, %s27_s13, [#allocation6], %s847_s22, %s847_s22, %s848_s23  }
  0x13   :  { %s849_s26 = smov [#allocation2]   ;;  %s850_s28 = smov [#allocation7]  }
  0x14   :  { %s17_s27 = sshll.u32 %s849_s26, 4  ;;  %s39_s29 = sshll.u32 %s850_s28, 4  ;;  %s18_s27 = int_to_ptr.vmem [resolvable:$true] %s17_s27  ;;  %s40_s29 = int_to_ptr.vmem [resolvable:$true] %s39_s29 }
  0x15   :  { %s774_s5 = scalar_lea.hbm %s967_s0, 128 }
  0x16   :  { %p775_p8 = scmp.ne.s32.totalorder %s967_s0, %s774_s5  ;;  %p778_p9 = scmp.lt.u32.totalorder %s774_s5, %s967_s0 }
  0x18   :  { %p780_p10 = pnand %p778_p9, %p775_p8 }
  0x1a   :  { %783 = shalt.err (!%p780_p10)
}
  0x1b   :  { %s784_s1 = scalar_lea.vmem %s18_s27, 128  ;;  %p789_p12 = scmp.lt.s32.totalorder %s18_s27, %s18_s27 }
  0x1c   :  { %p785_p11 = scmp.ne.s32.totalorder %s18_s27, %s784_s1  ;;  %p790_p13 = scmp.lt.s32.totalorder %s784_s1, %s784_s1 }
  0x1e   :  { %p791_p0 = por %p790_p13, %p789_p12 }
  0x20   :  { %p792_p1 = pnand %p791_p0, %p785_p11 }
  0x22   :  { %795 = shalt.err (!%p792_p1)
}
  0x23   :  { %20 = dma.hbm_to_vmem [thread:$0]  %s967_s0, 128, %s18_s27, [#allocation3]  }
  0x24   :  { %s796_s14 = scalar_lea.hbm %s969_s2, 128 }
  0x25   :  { %p797_p2 = scmp.ne.s32.totalorder %s969_s2, %s796_s14  ;;  %p800_p3 = scmp.lt.u32.totalorder %s796_s14, %s969_s2 }
  0x27   :  { %p802_p4 = pnand %p800_p3, %p797_p2 }
  0x29   :  { %805 = shalt.err (!%p802_p4)
}
  0x2a   :  { %s806_s19 = scalar_lea.vmem %s40_s29, 128  ;;  %p811_p6 = scmp.lt.s32.totalorder %s40_s29, %s40_s29 }
  0x2b   :  { %p807_p5 = scmp.ne.s32.totalorder %s40_s29, %s806_s19  ;;  %p812_p7 = scmp.lt.s32.totalorder %s806_s19, %s806_s19 }
  0x2d   :  { %p813_p8 = por %p812_p7, %p811_p6 }
  0x2f   :  { %p814_p9 = pnand %p813_p8, %p807_p5 }
  0x31   :  { %817 = shalt.err (!%p814_p9)
}
  0x32   :  { %42 = dma.hbm_to_vmem [thread:$0]  %s969_s2, 128, %s40_s29, [#allocation6]  }
  0x33   :  { %840 = dma.done.wait [#allocation3], 128  }
  0x34   :  { %841 = vsyncadd [#allocation3], 4294967168 }
  0x35   :  { %842 = dma.done.wait [#allocation6], 6272  }
  0x36   :  { %843 = vsyncadd [#allocation6], 4294961024  ;;  %v851_v0 = vmov 0.0|0.0   ;;  %vm852_vm0 = vmmov 0   ;;  %v853_v1 = vmov 0.0   ;;  %v53_v2 = vld [vmem:[#allocation5] sm:$0xff] }
  0x37   :  { %645 = vmatprep.subr.bf16.mxu0 %v851_v0  ;;  %537 = vmatprep.mubr.msk.f32.mxu0 %vm852_vm0, %v853_v1  ;;  %v54_v3 = vld [vmem:[#allocation5 + $0x8] sm:$0xff]  ;;  %v55_v4 = vld [vmem:[#allocation5 + $0x10] sm:$0xff]  ;;  %v56_v6 = vld [vmem:[#allocation5 + $0x18] sm:$0xff]  ;;  %s854_s2 = smov [#allocation8]  }
  0x38   :  { %669 = vmatprep.subr.bf16.mxu1 %v851_v0  ;;  %572 = vmatprep.mubr.msk.f32.mxu1 %vm852_vm0, %v853_v1  ;;  %v646_v5 = vpack.c.bf16 %v54_v3, %v53_v2  ;;  %v649_v7 = vpack.c.bf16 %v56_v6, %v55_v4  ;;  %v57_v8 = vld [vmem:[#allocation5 + $0x20] sm:$0xff]  ;;  %v58_v9 = vld [vmem:[#allocation5 + $0x28] sm:$0xff]  ;;  %v72_v12 = vld [vmem:[#allocation5 + $0x90] sm:$0xff]  ;;  %s423_s21 = sshll.u32 %s854_s2, 4  ;;  %s424_s21 = int_to_ptr.vmem [resolvable:$true] %s423_s21 }
  0x39   :  { %v70_v10 = vld [vmem:[#allocation5 + $0x80] sm:$0xff]  ;;  %v71_v11 = vld [vmem:[#allocation5 + $0x88] sm:$0xff]  ;;  %v73_v13 = vld [vmem:[#allocation5 + $0x98] sm:$0xff]  ;;  %v652_v14 = vpack.c.bf16 %v58_v9, %v57_v8  ;;  %s818_s22 = scalar_lea.vmem %s424_s21, 128  ;;  %p823_p11 = scmp.lt.s32.totalorder %s424_s21, %s424_s21 }
  0x3a   :  { %647 = vmatpush3.bf16.msra.mxu0 %v646_v5  ;;  %v670_v15 = vpack.c.bf16 %v71_v11, %v70_v10  ;;  %v59_v16 = vld [vmem:[#allocation5 + $0x30] sm:$0xff]  ;;  %v60_v17 = vld [vmem:[#allocation5 + $0x38] sm:$0xff]  ;;  %v673_v18 = vpack.c.bf16 %v73_v13, %v72_v12  ;;  %v74_v19 = vld [vmem:[#allocation5 + $0xa0] sm:$0xff]  ;;  %p819_p10 = scmp.ne.s32.totalorder %s424_s21, %s818_s22  ;;  %p824_p12 = scmp.lt.s32.totalorder %s818_s22, %s818_s22 }
  0x3b   :  { %648 = vmatprep.subr.bf16.mxu0 %v851_v0  ;;  %v75_v20 = vld [vmem:[#allocation5 + $0xa8] sm:$0xff]  ;;  %v655_v21 = vpack.c.bf16 %v60_v17, %v59_v16  ;;  %v61_v22 = vld [vmem:[#allocation5 + $0x40] sm:$0xff]  ;;  %v76_v25 = vld [vmem:[#allocation5 + $0xb0] sm:$0xff] }
  0x3c   :  { %671 = vmatpush3.bf16.msra.mxu1 %v670_v15  ;;  %v62_v23 = vld [vmem:[#allocation5 + $0x48] sm:$0xff]  ;;  %v676_v24 = vpack.c.bf16 %v75_v20, %v74_v19  ;;  %v77_v26 = vld [vmem:[#allocation5 + $0xb8] sm:$0xff]  ;;  %v63_v28 = vld [vmem:[#allocation5 + $0x50] sm:$0xff]  ;;  %p825_p13 = por %p824_p12, %p823_p11 }
  0x3d   :  { %672 = vmatprep.subr.bf16.mxu1 %v851_v0  ;;  %v658_v27 = vpack.c.bf16 %v62_v23, %v61_v22  ;;  %v64_v29 = vld [vmem:[#allocation5 + $0x58] sm:$0xff]  ;;  %v679_v30 = vpack.c.bf16 %v77_v26, %v76_v25  ;;  %v78_v31 = vld [vmem:[#allocation5 + $0xc0] sm:$0xff]  ;;  %v79_v32 = vld [vmem:[#allocation5 + $0xc8] sm:$0xff] }
  0x3e   :  { %650 = vmatpush3.bf16.msra.mxu0 %v649_v7  ;;  %v661_v33 = vpack.c.bf16 %v64_v29, %v63_v28  ;;  %v65_v34 = vld [vmem:[#allocation5 + $0x60] sm:$0xff]  ;;  %v66_v35 = vld [vmem:[#allocation5 + $0x68] sm:$0xff]  ;;  %v682_v36 = vpack.c.bf16 %v79_v32, %v78_v31  ;;  %v80_v37 = vld [vmem:[#allocation5 + $0xd0] sm:$0xff]  ;;  %p826_p0 = pnand %p825_p13, %p819_p10 }
  0x3f   :  { %651 = vmatprep.subr.bf16.mxu0 %v851_v0  ;;  %v81_v38 = vld [vmem:[#allocation5 + $0xd8] sm:$0xff]  ;;  %v664_v39 = vpack.c.bf16 %v66_v35, %v65_v34  ;;  %v67_v40 = vld [vmem:[#allocation5 + $0x70] sm:$0xff]  ;;  %v82_v43 = vld [vmem:[#allocation5 + $0xe0] sm:$0xff] }
  0x40   :  { %674 = vmatpush3.bf16.msra.mxu1 %v673_v18  ;;  %v68_v41 = vld [vmem:[#allocation5 + $0x78] sm:$0xff]  ;;  %v685_v42 = vpack.c.bf16 %v81_v38, %v80_v37  ;;  %v83_v44 = vld [vmem:[#allocation5 + $0xe8] sm:$0xff]  ;;  %v84_v48 = vld [vmem:[#allocation5 + $0xf0] sm:$0xff] }
  0x41   :  { %675 = vmatprep.subr.bf16.mxu1 %v851_v0  ;;  %v667_v45 = vpack.c.bf16 %v68_v41, %v67_v40  ;;  %v688_v46 = vpack.c.bf16 %v83_v44, %v82_v43  ;;  %v930_v47 = vld [vmem:[#allocation2] sm:$0xff]  ;;  %v87_v51 = vld [vmem:[#allocation5 + $0x100] sm:$0xff]  ;;  %v88_v52 = vld [vmem:[#allocation5 + $0x108] sm:$0xff] }
  0x42   :  { %653 = vmatpush3.bf16.msra.mxu0 %v652_v14  ;;  %v85_v49 = vld [vmem:[#allocation5 + $0xf8] sm:$0xff]  ;;  %v694_v53 = vpack.c.bf16 %v88_v52, %v87_v51  ;;  %v89_v54 = vld [vmem:[#allocation5 + $0x110] sm:$0xff]  ;;  %v91_v57 = vld [vmem:[#allocation5 + $0x120] sm:$0xff] }
  0x43   :  { %654 = vmatprep.subr.bf16.mxu0 %v851_v0  ;;  %v691_v50 = vpack.c.bf16 %v85_v49, %v84_v48  ;;  %v90_v55 = vld [vmem:[#allocation5 + $0x118] sm:$0xff]  ;;  %v92_v58 = vld [vmem:[#allocation5 + $0x128] sm:$0xff]  ;;  %v93_v60 = vld [vmem:[#allocation5 + $0x130] sm:$0xff] }
  0x44   :  { %677 = vmatpush3.bf16.msra.mxu1 %v676_v24  ;;  %v697_v56 = vpack.c.bf16 %v90_v55, %v89_v54  ;;  %v700_v59 = vpack.c.bf16 %v92_v58, %v91_v57  ;;  %v94_v61 = vld [vmem:[#allocation5 + $0x138] sm:$0xff]  ;;  %v95_v63 = vld [vmem:[#allocation5 + $0x140] sm:$0xff]  ;;  %v96_v2 = vld [vmem:[#allocation5 + $0x148] sm:$0xff] }
  0x45   :  { %678 = vmatprep.subr.bf16.mxu1 %v851_v0  ;;  %v703_v62 = vpack.c.bf16 %v94_v61, %v93_v60  ;;  %v706_v3 = vpack.c.bf16 %v96_v2, %v95_v63  ;;  %v97_v4 = vld [vmem:[#allocation5 + $0x150] sm:$0xff]  ;;  %v98_v5 = vld [vmem:[#allocation5 + $0x158] sm:$0xff]  ;;  %v99_v7 = vld [vmem:[#allocation5 + $0x160] sm:$0xff] }
  0x46   :  { %656 = vmatpush3.bf16.msra.mxu0 %v655_v21  ;;  %v709_v6 = vpack.c.bf16 %v98_v5, %v97_v4  ;;  %v100_v8 = vld [vmem:[#allocation5 + $0x168] sm:$0xff]  ;;  %v433_v10 = vld [vmem:[#allocation7] ss:$0 sm:$0xff]  ;;  %v102_v15 = vld [vmem:[#allocation5 + $0x178] sm:$0xff] }
  0x47   :  { %657 = vmatprep.subr.bf16.mxu0 %v851_v0  ;;  %v712_v9 = vpack.c.bf16 %v100_v8, %v99_v7  ;;  %v434_v17 = vld [vmem:[#allocation7 + $0x1] ss:$0 sm:$0xff]  ;;  %v435_v29 = vld [vmem:[#allocation7 + $0x2] ss:$0 sm:$0xff]  ;;  %v436_v32 = vld [vmem:[#allocation7 + $0x3] ss:$0 sm:$0xff] }
  0x48   :  { %680 = vmatpush3.bf16.msra.mxu1 %v679_v30 }
  0x49   :  { %681 = vmatprep.subr.bf16.mxu1 %v851_v0 }
  0x4a   :  { %659 = vmatpush3.bf16.msra.mxu0 %v658_v27 }
  0x4b   :  { %660 = vmatprep.subr.bf16.mxu0 %v851_v0 }
  0x4c   :  { %683 = vmatpush3.bf16.msra.mxu1 %v682_v36 }
  0x4d   :  { %684 = vmatprep.subr.bf16.mxu1 %v851_v0 }
  0x4e   :  { %662 = vmatpush3.bf16.msra.mxu0 %v661_v33 }
  0x4f   :  { %663 = vmatprep.subr.bf16.mxu0 %v851_v0 }
  0x50   :  { %686 = vmatpush3.bf16.msra.mxu1 %v685_v42 }
  0x51   :  { %687 = vmatprep.subr.bf16.mxu1 %v851_v0 }
  0x52   :  { %665 = vmatpush3.bf16.msra.mxu0 %v664_v39 }
  0x53   :  { %666 = vmatprep.subr.bf16.mxu0 %v851_v0 }
  0x54   :  { %689 = vmatpush3.bf16.msra.mxu1 %v688_v46 }
  0x55   :  { %690 = vmatprep.subr.bf16.mxu1 %v851_v0 }
  0x56   :  { %668 = vmatpush3.bf16.msra.mxu0 %v667_v45 }
  0x57   :  { %693 = vmatprep.subr.bf16.mxu0 %v851_v0 }
  0x58   :  { %692 = vmatpush3.bf16.msra.mxu1 %v691_v50 }
  0x59   :  { %538 = vmatmul.mubr.f32.vlgmr.msra.gmra.mrb[0].mxu0 %v930_v47  ;;  %717 = vmatprep.subr.bf16.mxu1 %v851_v0 }
  0x5a   :  { %607 = vmatprep.mubr.msk.f32.mxu0 %vm852_vm0, %v853_v1  ;;  %695 = vmatpush3.bf16.msra.mxu0 %v694_v53 }
  0x5b   :  { %696 = vmatprep.subr.bf16.mxu0 %v851_v0 }
  0x5e   :  { %698 = vmatpush3.bf16.msra.mxu0 %v697_v56 }
  0x5f   :  { %699 = vmatprep.subr.bf16.mxu0 %v851_v0 }
  0x62   :  { %701 = vmatpush3.bf16.msra.mxu0 %v700_v59 }
  0x63   :  { %702 = vmatprep.subr.bf16.mxu0 %v851_v0 }
  0x66   :  { %704 = vmatpush3.bf16.msra.mxu0 %v703_v62 }
  0x67   :  { %705 = vmatprep.subr.bf16.mxu0 %v851_v0 }
  0x6a   :  { %707 = vmatpush3.bf16.msra.mxu0 %v706_v3 }
  0x6b   :  { %708 = vmatprep.subr.bf16.mxu0 %v851_v0 }
  0x6e   :  { %710 = vmatpush3.bf16.msra.mxu0 %v709_v6 }
  0x6f   :  { %711 = vmatprep.subr.bf16.mxu0 %v851_v0 }
  0x72   :  { %713 = vmatpush3.bf16.msra.mxu0 %v712_v9 }
  0x73   :  { %714 = vmatprep.subr.bf16.mxu0 %v851_v0 }
 0x12c   :  { %v177_v11 = vpop.f32.mrb[0].mxu0 }
 0x12d   :  { %v178_v12 = vadd.f32 %v433_v10, %v177_v11  ;;  %v539_v13 = vpop.f32.mrb[1].mxu0 }
 0x12f   :  { %v181_v14 = vmax.f32 %v178_v12, 0.0 }
 0x131   :  { %573 = vmatmul.mubr.f32.vlgmr.msra.gmra.mrb[0].mxu1 %v181_v14 }
 0x132   :  { %719 = vmatpush3.bf16.msra.mxu1 %v694_v53  ;;  %642 = vmatprep.mubr.msk.f32.mxu1 %vm852_vm0, %v853_v1  ;;  %v101_v1 = vld [vmem:[#allocation5 + $0x170] sm:$0xff] }
 0x133   :  { %720 = vmatprep.subr.bf16.mxu1 %v851_v0  ;;  %v715_v16 = vpack.c.bf16 %v102_v15, %v101_v1 }
 0x135   :  { %716 = vmatpush3.bf16.msra.mxu0 %v715_v16 }
 0x136   :  { %722 = vmatpush3.bf16.msra.mxu1 %v697_v56 }
 0x137   :  { %723 = vmatprep.subr.bf16.mxu1 %v851_v0 }
 0x13a   :  { %725 = vmatpush3.bf16.msra.mxu1 %v700_v59 }
 0x13b   :  { %726 = vmatprep.subr.bf16.mxu1 %v851_v0 }
 0x13e   :  { %728 = vmatpush3.bf16.msra.mxu1 %v703_v62 }
 0x13f   :  { %729 = vmatprep.subr.bf16.mxu1 %v851_v0 }
 0x142   :  { %731 = vmatpush3.bf16.msra.mxu1 %v706_v3 }
 0x143   :  { %732 = vmatprep.subr.bf16.mxu1 %v851_v0 }
 0x146   :  { %734 = vmatpush3.bf16.msra.mxu1 %v709_v6 }
 0x147   :  { %735 = vmatprep.subr.bf16.mxu1 %v851_v0 }
 0x14a   :  { %737 = vmatpush3.bf16.msra.mxu1 %v712_v9 }
 0x14b   :  { %738 = vmatprep.subr.bf16.mxu1 %v851_v0 }
 0x14e   :  { %740 = vmatpush3.bf16.msra.mxu1 %v715_v16 }
 0x204   :  { %v248_v18 = vpop.f32.mrb[0].mxu1 }
 0x205   :  { %v252_v19 = vadd.f32 %v248_v18, %v930_v47  ;;  %v574_v20 = vpop.f32.mrb[1].mxu1 }
 0x207   :  { %v257_v21 = vadd.f32 %v434_v17, %v252_v19 }
 0x209   :  { %v328_v22 = vmul.f32 %v257_v21, %v257_v21  ;;  %608 = vmatmul.mubr.f32.vlgmr.msra.gmra.mrb[2].mxu0 %v257_v21 }
 0x20b   :  { %643 = vmatmul.mubr.f32.vlgmr.msra.gmra.mrb[2].mxu1 %v328_v22 }
 0x2dc   :  { %v324_v23 = vpop.f32.mrb[2].mxu0 }
 0x2dd   :  { %v399_v24 = vmul.f32 %v324_v23, %v324_v23  ;;  %v609_v25 = vpop.f32.mrb[3].mxu0 }
 0x2de   :  { %v395_v26 = vpop.f32.mrb[2].mxu1 }
 0x2df   :  { %v400_v27 = vsub.f32 %v395_v26, %v399_v24  ;;  %v644_v0 = vpop.f32.mrb[3].mxu1 }
 0x2e1   :  { %v401_v28 = vadd.f32 1e-05, %v400_v27 }
 0x2e3   :  { %750 = vrsqrt.f32 %v401_v28 }
 0x2ed   :  { %v751_v30 = vpop.eup %750 }
 0x2ee   :  { %v407_v31 = vmul.f32 %v751_v30, %v435_v29 }
 0x2f0   :  { %v409_v33 = vmul.f32 %v407_v31, %v324_v23  ;;  %v408_v34 = vmul.f32 %v407_v31, %v257_v21 }
 0x2f2   :  { %v414_v35 = vsub.f32 %v436_v32, %v409_v33 }
 0x2f4   :  { %v415_v36 = vadd.f32 %v414_v35, %v408_v34 }
 0x2f6   :  { %416 = vst [vmem:[#allocation8] sm:$0xff] %v415_v36 }
 0x2f7   :  { %829 = shalt.err (!%p826_p0)
}
 0x2f8   :  { %s830_s25 = scalar_lea.hbm %s970_s3, 128 }
 0x2f9   :  { %p831_p1 = scmp.ne.s32.totalorder %s970_s3, %s830_s25  ;;  %p834_p2 = scmp.lt.u32.totalorder %s830_s25, %s970_s3 }
 0x2fb   :  { %p836_p3 = pnand %p834_p2, %p831_p1 }
 0x2fd   :  { %839 = shalt.err (!%p836_p3)
}
 0x2fe   :  { %426 = dma.vmem_to_hbm [thread:$0]  %s424_s21, 128, %s970_s3, [#allocation4]  }
 0x2ff   :  { %844 = dma.done.wait [#allocation4], 128  }
 0x300   :  { %845 = vsyncadd [#allocation4], 4294967168 }
 0x301   :  { %430 = vsyncpa [#allocation3], 1 }
 0x302   :  { %431 = vsyncpa [#allocation6], 1 }
 0x303   :  { %432 = vsyncpa [#allocation4], 1 }

</bundles_post_ra>
